<compile_context>
chip_gen: v7x
topology: tpu7x:2x2x1
jax: 0.10.0
libtpu: 0.0.40
codegen_flags: <defaults>
</compile_context>

<pallas_src>
import jax
import jax.numpy as jnp
from jax.experimental import pallas as pl
from jax.experimental.pallas import tpu as pltpu

IN_F = 28 * 28        # 784
HID = 500
HID_PAD = 512         # 128-multiple hidden width (extra cols/rows are zeros)
OUT_F = 10
OUT_PAD = 128         # lane-dense padded output width
TILE_N_DEFAULT = 1024 # batch rows per grid step (multiple of 256)


def _round_up(x, m):
    return ((x + m - 1) // m) * m


def _choose_tile_n(n, tile_n):
    """Pick the batch tile: big enough to amortize grid-step overhead, small
    enough to bound tail padding, and (for large batches) yielding >= 2 grid
    tiles so v7x megacore can use both TensorCores."""
    if n <= 256:
        return _round_up(max(n, 1), 8)          # small batch: minimal padding
    tile_n = min(tile_n, _round_up(n, 256))      # bound tail-padding waste
    tile_n = min(tile_n, _round_up(pl.cdiv(n, 2), 256))  # >= 2 tiles
    return max(tile_n, 256)


def _mlp_kernel(x_ref, w1_ref, b1_ref, w2_ref, b2_ref, o_ref):
    # x_ref:  (TILE_N, 784)   f32  (cast to bf16 in-kernel; hides under MXU)
    # w1_ref: (784, 512)      bf16 (VMEM-resident across grid steps)
    # b1_ref: (1, 512)        f32
    # w2_ref: (512, 128)      bf16 (zero-padded beyond col 10 / row 500)
    # b2_ref: (1, 128)        f32  (zero-padded beyond col 10)
    # o_ref:  (TILE_N, 128)   f32
    x = x_ref[...].astype(jnp.bfloat16)
    h = jnp.dot(x, w1_ref[...],
                preferred_element_type=jnp.float32)        # MXU, f32 acc
    h = jnp.maximum(h + b1_ref[...], 0.0)                  # bias + ReLU in f32
    y = jnp.dot(h.astype(jnp.bfloat16), w2_ref[...],
                preferred_element_type=jnp.float32)        # MXU, f32 acc
    o_ref[...] = (y + b2_ref[...]).astype(o_ref.dtype)


def prepare_params(w1, b1, w2, b2):
    """One-time weight prep (cast/pad), hoisted out of the per-call path.
    w1: (784, 500), b1: (500,), w2: (500, 10), b2: (10,)  [x @ W layout]."""
    w1p = jnp.pad(w1.astype(jnp.float32),
                  ((0, 0), (0, HID_PAD - HID))).astype(jnp.bfloat16)
    b1p = jnp.pad(b1.reshape(1, HID).astype(jnp.float32),
                  ((0, 0), (0, HID_PAD - HID)))
    w2p = jnp.pad(w2.astype(jnp.float32),
                  ((0, HID_PAD - HID), (0, OUT_PAD - OUT_F))).astype(jnp.bfloat16)
    b2p = jnp.pad(b2.reshape(1, OUT_F).astype(jnp.float32),
                  ((0, 0), (0, OUT_PAD - OUT_F)))
    return {"w1": w1p, "b1": b1p, "w2": w2p, "b2": b2p}


def net_forward(x, params, *, tile_n=TILE_N_DEFAULT, return_padded=False):
    """Forward pass of Net.  x: (N, 1, 28, 28) or (N, 784), any float dtype.
    params: output of prepare_params().  Returns (N, 10) f32, or the raw
    lane-dense (n_pad, 128) kernel output if return_padded=True (for fused
    consumers that want to skip the slice pass)."""
    x2 = x.reshape(-1, IN_F).astype(jnp.float32)
    n = x2.shape[0]

    tile_n = _choose_tile_n(n, tile_n)
    n_pad = _round_up(n, tile_n)
    if n_pad != n:
        x2 = jnp.pad(x2, ((0, n_pad - n), (0, 0)))

    grid = (n_pad // tile_n,)

    flops = 2 * n_pad * IN_F * HID_PAD + 2 * n_pad * HID_PAD * OUT_PAD
    bytes_accessed = (n_pad * IN_F * 4                      # x (f32 read)
                      + IN_F * HID_PAD * 2                  # W1 (bf16)
                      + HID_PAD * OUT_PAD * 2               # W2 (bf16)
                      + (HID_PAD + OUT_PAD) * 4             # biases
                      + n_pad * OUT_PAD * 4)                # out (f32 write)
    cost = pl.CostEstimate(flops=flops, transcendentals=0,
                           bytes_accessed=bytes_accessed)

    out_pad = pl.pallas_call(
        _mlp_kernel,
        out_shape=jax.ShapeDtypeStruct((n_pad, OUT_PAD), jnp.float32),
        grid_spec=pltpu.PrefetchScalarGridSpec(
            num_scalar_prefetch=0,
            grid=grid,
            in_specs=[
                pl.BlockSpec((tile_n, IN_F), lambda i: (i, 0)),
                pl.BlockSpec((IN_F, HID_PAD), lambda i: (0, 0)),
                pl.BlockSpec((1, HID_PAD), lambda i: (0, 0)),
                pl.BlockSpec((HID_PAD, OUT_PAD), lambda i: (0, 0)),
                pl.BlockSpec((1, OUT_PAD), lambda i: (0, 0)),
            ],
            out_specs=pl.BlockSpec((tile_n, OUT_PAD), lambda i: (i, 0)),
        ),
        compiler_params=pltpu.CompilerParams(
            dimension_semantics=("parallel",),
            vmem_limit_bytes=64 << 20),
        cost_estimate=cost,
    )(x2, params["w1"], params["b1"], params["w2"], params["b2"])

    if return_padded:
        return out_pad
    return out_pad[:n, :OUT_F]


def init_params(key):
    """Deterministic init mimicking PyTorch's default Linear init
    (uniform(-1/sqrt(fan_in), 1/sqrt(fan_in))).  Weights stored as (in, out)
    so the kernel computes x @ W (== x @ W_torch.T)."""
    k1, k2, k3, k4 = jax.random.split(key, 4)
    bound1 = 1.0 / jnp.sqrt(jnp.float32(IN_F))
    bound2 = 1.0 / jnp.sqrt(jnp.float32(HID))
    w1 = jax.random.uniform(k1, (IN_F, HID), jnp.float32, -bound1, bound1)
    b1 = jax.random.uniform(k2, (HID,), jnp.float32, -bound1, bound1)
    w2 = jax.random.uniform(k3, (HID, OUT_F), jnp.float32, -bound2, bound2)
    b2 = jax.random.uniform(k4, (OUT_F,), jnp.float32, -bound2, bound2)
    return w1, b1, w2, b2


if __name__ == "__main__":
    key = jax.random.PRNGKey(0)
    kx, kp = jax.random.split(key)

    # MNIST-like input: NCHW (N, 1, 28, 28)
    x = jax.random.normal(kx, (2, 1, 28, 28), jnp.float32)
    w1, b1, w2, b2 = init_params(kp)
    params = prepare_params(w1, b1, w2, b2)   # one-time weight prep

    out = net_forward(x, params)
    out = jax.block_until_ready(out)

    # Reference in plain f32 JAX; loose tolerance since the kernel uses
    # bf16 matmul operands with f32 accumulation.
    x2 = x.reshape(-1, IN_F)
    ref = jnp.maximum(x2 @ w1 + b1, 0.0) @ w2 + b2
    assert out.shape == (2, OUT_F)
    assert jnp.allclose(out, ref, atol=2e-2, rtol=2e-2), (
        jnp.max(jnp.abs(out - ref)))

    print("KERNEL_OK")
</pallas_src>

<mosaic_0001>
module attributes {stable_mosaic.version = 11 : i64} {
  func.func @_mlp_kernel(%arg0: i32, %arg1: memref<8x784xf32, #tpu.memory_space<vmem>>, %arg2: memref<784x512xbf16, #tpu.memory_space<vmem>>, %arg3: memref<1x512xf32, #tpu.memory_space<vmem>>, %arg4: memref<512x128xbf16, #tpu.memory_space<vmem>>, %arg5: memref<1x128xf32, #tpu.memory_space<vmem>>, %arg6: memref<8x128xf32, #tpu.memory_space<vmem>>) attributes {dimension_semantics = [#tpu.dimension_semantics<parallel>], iteration_bounds = array<i64: 1>, scalar_prefetch = 0 : i64, scratch_operands = 0 : i64, tpu.core_type = #tpu.core_type<tc>, window_params = [{transform_indices = @transform_0, window_bounds = array<i64: 8, 784>}, {pipeline_mode = #tpu.pipeline_mode<synchronous>, transform_indices = @transform_1, window_bounds = array<i64: 784, 512>}, {pipeline_mode = #tpu.pipeline_mode<synchronous>, transform_indices = @transform_2, window_bounds = array<i64: 1, 512>}, {pipeline_mode = #tpu.pipeline_mode<synchronous>, transform_indices = @transform_3, window_bounds = array<i64: 512, 128>}, {pipeline_mode = #tpu.pipeline_mode<synchronous>, transform_indices = @transform_4, window_bounds = array<i64: 1, 128>}, {transform_indices = @transform_5, window_bounds = array<i64: 8, 128>}]} {
    %c0 = arith.constant 0 : index
    %c0_0 = arith.constant 0 : index
    %0 = vector.load %arg1[%c0, %c0_0] : memref<8x784xf32, #tpu.memory_space<vmem>>, vector<8x784xf32>
    %1 = arith.truncf %0 : vector<8x784xf32> to vector<8x784xbf16>
    %c0_1 = arith.constant 0 : index
    %c0_2 = arith.constant 0 : index
    %2 = vector.load %arg2[%c0_1, %c0_2] : memref<784x512xbf16, #tpu.memory_space<vmem>>, vector<784x512xbf16>
    %cst = arith.constant dense<0.000000e+00> : vector<8x512xf32>
    %3 = tpu.matmul %1, %2, %cst {dimension_numbers = #tpu.dot_dimension_numbers<[1], [0], [0], [1], [0, 0, 1, 1], [], []>} : vector<8x784xbf16>, vector<784x512xbf16>, vector<8x512xf32> -> vector<8x512xf32>
    %c0_3 = arith.constant 0 : index
    %c0_4 = arith.constant 0 : index
    %4 = vector.load %arg3[%c0_3, %c0_4] : memref<1x512xf32, #tpu.memory_space<vmem>>, vector<1x512xf32>
    %5 = vector.broadcast %4 : vector<1x512xf32> to vector<8x512xf32>
    %6 = arith.addf %3, %5 : vector<8x512xf32>
    %cst_5 = arith.constant 0.000000e+00 : f32
    %7 = vector.broadcast %cst_5 : f32 to vector<8x512xf32>
    %8 = arith.maximumf %6, %7 : vector<8x512xf32>
    %9 = arith.truncf %8 : vector<8x512xf32> to vector<8x512xbf16>
    %c0_6 = arith.constant 0 : index
    %c0_7 = arith.constant 0 : index
    %10 = vector.load %arg4[%c0_6, %c0_7] : memref<512x128xbf16, #tpu.memory_space<vmem>>, vector<512x128xbf16>
    %cst_8 = arith.constant dense<0.000000e+00> : vector<8x128xf32>
    %11 = tpu.matmul %9, %10, %cst_8 {dimension_numbers = #tpu.dot_dimension_numbers<[1], [0], [0], [1], [0, 0, 1, 1], [], []>} : vector<8x512xbf16>, vector<512x128xbf16>, vector<8x128xf32> -> vector<8x128xf32>
    %c0_9 = arith.constant 0 : index
    %c0_10 = arith.constant 0 : index
    %12 = vector.load %arg5[%c0_9, %c0_10] : memref<1x128xf32, #tpu.memory_space<vmem>>, vector<1x128xf32>
    %13 = vector.broadcast %12 : vector<1x128xf32> to vector<8x128xf32>
    %14 = arith.addf %11, %13 : vector<8x128xf32>
    %c0_11 = arith.constant 0 : index
    %c0_12 = arith.constant 0 : index
    %15 = vector.load %arg6[%c0_11, %c0_12] : memref<8x128xf32, #tpu.memory_space<vmem>>, vector<8x128xf32>
    tpu.vector_store %arg6[%c0_11, %c0_12], %14 {strides = array<i32>} : memref<8x128xf32, #tpu.memory_space<vmem>>, vector<8x128xf32>,
    return
  }
  func.func @transform_0(%arg0: i32) -> (i32, i32) {
    %c0_i32 = arith.constant 0 : i32
    %c0_i32_0 = arith.constant 0 : i32
    return %arg0, %c0_i32 : i32, i32
  }
  func.func @transform_1(%arg0: i32) -> (i32, i32) {
    %c0_i32 = arith.constant 0 : i32
    %c0_i32_0 = arith.constant 0 : i32
    %c0_i32_1 = arith.constant 0 : i32
    return %c0_i32, %c0_i32_0 : i32, i32
  }
  func.func @transform_2(%arg0: i32) -> (i32, i32) {
    %c0_i32 = arith.constant 0 : i32
    %c0_i32_0 = arith.constant 0 : i32
    %c0_i32_1 = arith.constant 0 : i32
    return %c0_i32, %c0_i32_0 : i32, i32
  }
  func.func @transform_3(%arg0: i32) -> (i32, i32) {
    %c0_i32 = arith.constant 0 : i32
    %c0_i32_0 = arith.constant 0 : i32
    %c0_i32_1 = arith.constant 0 : i32
    return %c0_i32, %c0_i32_0 : i32, i32
  }
  func.func @transform_4(%arg0: i32) -> (i32, i32) {
    %c0_i32 = arith.constant 0 : i32
    %c0_i32_0 = arith.constant 0 : i32
    %c0_i32_1 = arith.constant 0 : i32
    return %c0_i32, %c0_i32_0 : i32, i32
  }
  func.func @transform_5(%arg0: i32) -> (i32, i32) {
    %c0_i32 = arith.constant 0 : i32
    %c0_i32_0 = arith.constant 0 : i32
    return %arg0, %c0_i32 : i32, i32
  }
}

</mosaic_0001>

<bundles_post_ra>
// kernel: tpu_custom_call.1
= control target key start
LH: loop header
LB: loop body
LE: loop exit
PB: predicated region body
PF: predicated region fallthrough
CT: control target
= control target key end

     0   :  { %10 = vsyncpa [#allocation3], 0  ;;  %s2890_s0 = inlined_call_operand.hbm [shape: f32[8,784], index: 0, kind: input, shape index: {}]   ;;  %s2891_s1 = inlined_call_operand.hbm [shape: bf16[784,512], index: 1, kind: input, shape index: {}]   ;;  %s2892_s2 = inlined_call_operand.hbm [shape: f32[1,512], index: 2, kind: input, shape index: {}]   ;;  %s2893_s3 = inlined_call_operand.hbm [shape: bf16[512,128], index: 3, kind: input, shape index: {}]   ;;  %s2894_s4 = inlined_call_operand.hbm [shape: f32[1,128], index: 4, kind: input, shape index: {}]   ;;  %s2895_s5 = inlined_call_operand.hbm [shape: f32[8,128], index: 5, kind: output, shape index: {}]  }
   0x1   :  { %11 = vsyncpa [#allocation6], 0 }
   0x2   :  { %12 = vsyncpa [#allocation9], 0 }
   0x3   :  { %13 = vsyncpa [#allocation4], 0  ;;  %s2777_s18 = smov [#allocation5]   ;;  %s2637_s22 = scalar_lea.hbm %s2891_s1, 25088 }
   0x4   :  { %s29_s19 = sshll.u32 %s2777_s18, 4  ;;  %p2638_p0 = scmp.ne.s32.totalorder %s2891_s1, %s2637_s22  ;;  %s30_s19 = int_to_ptr.vmem [resolvable:$true] %s29_s19 }
   0x5   :  { %p2641_p1 = scmp.lt.u32.totalorder %s2637_s22, %s2891_s1 }
   0x7   :  { %p2643_p2 = pnand %p2641_p1, %p2638_p0 }
   0x9   :  { %2646 = shalt.err (!%p2643_p2)
}
   0xa   :  { %s2647_s27 = scalar_lea.vmem %s30_s19, 25088  ;;  %p2652_p4 = scmp.lt.s32.totalorder %s30_s19, %s30_s19 }
   0xb   :  { %p2648_p3 = scmp.ne.s32.totalorder %s30_s19, %s2647_s27  ;;  %p2653_p5 = scmp.lt.s32.totalorder %s2647_s27, %s2647_s27 }
   0xd   :  { %p2654_p6 = por %p2653_p5, %p2652_p4 }
   0xf   :  { %p2655_p7 = pnand %p2654_p6, %p2648_p3 }
  0x11   :  { %2658 = shalt.err (!%p2655_p7)
}
  0x12   :  { %s2778_s28 = smov 256   ;;  %s2779_s29 = smov 16  }
  0x13   :  { %35 = dma.hbm_to_vmem [thread:$0]  %s2891_s1, 25088, %s30_s19, [#allocation6], %s2778_s28, %s2778_s28, %s2779_s29  }
  0x14   :  { %s2780_s7 = smov [#allocation8]   ;;  %s2659_s11 = scalar_lea.hbm %s2893_s3, 4096 }
  0x15   :  { %s51_s8 = sshll.u32 %s2780_s7, 4  ;;  %p2660_p8 = scmp.ne.s32.totalorder %s2893_s3, %s2659_s11  ;;  %s52_s8 = int_to_ptr.vmem [resolvable:$true] %s51_s8 }
  0x16   :  { %p2663_p9 = scmp.lt.u32.totalorder %s2659_s11, %s2893_s3 }
  0x18   :  { %p2665_p10 = pnand %p2663_p9, %p2660_p8 }
  0x1a   :  { %2668 = shalt.err (!%p2665_p10)
}
  0x1b   :  { %s2669_s16 = scalar_lea.vmem %s52_s8, 4096  ;;  %p2674_p12 = scmp.lt.s32.totalorder %s52_s8, %s52_s8 }
  0x1c   :  { %p2670_p11 = scmp.ne.s32.totalorder %s52_s8, %s2669_s16  ;;  %p2675_p13 = scmp.lt.s32.totalorder %s2669_s16, %s2669_s16 }
  0x1e   :  { %p2676_p0 = por %p2675_p13, %p2674_p12 }
  0x20   :  { %p2677_p1 = pnand %p2676_p0, %p2670_p11 }
  0x22   :  { %2680 = shalt.err (!%p2677_p1)
}
  0x23   :  { %s2781_s1 = smov 64   ;;  %s2782_s17 = smov 4  }
  0x24   :  { %57 = dma.hbm_to_vmem [thread:$0]  %s2893_s3, 4096, %s52_s8, [#allocation9], %s2781_s1, %s2781_s1, %s2782_s17  }
  0x25   :  { %s2783_s20 = smov [#allocation2]   ;;  %s2784_s22 = smov [#allocation7]  }
  0x26   :  { %s20_s21 = sshll.u32 %s2783_s20, 4  ;;  %s42_s23 = sshll.u32 %s2784_s22, 4  ;;  %s21_s21 = int_to_ptr.vmem [resolvable:$true] %s20_s21  ;;  %s43_s23 = int_to_ptr.vmem [resolvable:$true] %s42_s23 }
  0x27   :  { %s2681_s26 = scalar_lea.hbm %s2890_s0, 896 }
  0x28   :  { %p2682_p2 = scmp.ne.s32.totalorder %s2890_s0, %s2681_s26  ;;  %p2685_p3 = scmp.lt.u32.totalorder %s2681_s26, %s2890_s0 }
  0x2a   :  { %p2687_p4 = pnand %p2685_p3, %p2682_p2 }
  0x2c   :  { %2690 = shalt.err (!%p2687_p4)
}
  0x2d   :  { %s2691_s3 = scalar_lea.vmem %s21_s21, 896  ;;  %p2696_p6 = scmp.lt.s32.totalorder %s21_s21, %s21_s21 }
  0x2e   :  { %p2692_p5 = scmp.ne.s32.totalorder %s21_s21, %s2691_s3  ;;  %p2697_p7 = scmp.lt.s32.totalorder %s2691_s3, %s2691_s3 }
  0x30   :  { %p2698_p8 = por %p2697_p7, %p2696_p6 }
  0x32   :  { %p2699_p9 = pnand %p2698_p8, %p2692_p5 }
  0x34   :  { %2702 = shalt.err (!%p2699_p9)
}
  0x35   :  { %23 = dma.hbm_to_vmem [thread:$0]  %s2890_s0, 896, %s21_s21, [#allocation3]  }
  0x36   :  { %s2703_s10 = scalar_lea.hbm %s2892_s2, 64 }
  0x37   :  { %p2704_p10 = scmp.ne.s32.totalorder %s2892_s2, %s2703_s10  ;;  %p2707_p11 = scmp.lt.u32.totalorder %s2703_s10, %s2892_s2 }
  0x39   :  { %p2709_p12 = pnand %p2707_p11, %p2704_p10 }
  0x3b   :  { %2712 = shalt.err (!%p2709_p12)
}
  0x3c   :  { %s2713_s15 = scalar_lea.vmem %s43_s23, 64  ;;  %p2718_p0 = scmp.lt.s32.totalorder %s43_s23, %s43_s23 }
  0x3d   :  { %p2714_p13 = scmp.ne.s32.totalorder %s43_s23, %s2713_s15  ;;  %p2719_p1 = scmp.lt.s32.totalorder %s2713_s15, %s2713_s15 }
  0x3f   :  { %p2720_p2 = por %p2719_p1, %p2718_p0 }
  0x41   :  { %p2721_p3 = pnand %p2720_p2, %p2714_p13 }
  0x43   :  { %2724 = shalt.err (!%p2721_p3)
}
  0x44   :  { %45 = dma.hbm_to_vmem [thread:$0]  %s2892_s2, 64, %s43_s23, [#allocation6]  }
  0x45   :  { %s2785_s1 = smov [#allocation10]   ;;  %s2725_s20 = scalar_lea.hbm %s2894_s4, 16 }
  0x46   :  { %s64_s17 = sshll.u32 %s2785_s1, 4  ;;  %p2726_p4 = scmp.ne.s32.totalorder %s2894_s4, %s2725_s20  ;;  %s65_s17 = int_to_ptr.vmem [resolvable:$true] %s64_s17 }
  0x47   :  { %p2729_p5 = scmp.lt.u32.totalorder %s2725_s20, %s2894_s4 }
  0x49   :  { %p2731_p6 = pnand %p2729_p5, %p2726_p4 }
  0x4b   :  { %2734 = shalt.err (!%p2731_p6)
}
  0x4c   :  { %s2735_s26 = scalar_lea.vmem %s65_s17, 16  ;;  %s2739_s2 = scalar_lea.vmem %s65_s17, 32 }
  0x4d   :  { %p2736_p7 = scmp.ne.s32.totalorder %s65_s17, %s2735_s26  ;;  %p2740_p8 = scmp.lt.s32.totalorder %s65_s17, %s65_s17 }
  0x4e   :  { %p2741_p9 = scmp.lt.s32.totalorder %s2739_s2, %s2735_s26 }
  0x50   :  { %p2742_p10 = por %p2741_p9, %p2740_p8 }
  0x52   :  { %p2743_p11 = pnand %p2742_p10, %p2736_p7 }
  0x54   :  { %2746 = shalt.err (!%p2743_p11)
}
  0x55   :  { %67 = dma.hbm_to_vmem [thread:$0]  %s2894_s4, 16, %s65_s17, [#allocation9]  }
  0x56   :  { %2769 = dma.done.wait [#allocation3], 896  }
  0x57   :  { %2770 = vsyncadd [#allocation3], 4294966400 }
  0x58   :  { %2771 = dma.done.wait [#allocation6], 25152  }
  0x59   :  { %2772 = vsyncadd [#allocation6], 4294942144 }
  0x5a   :  { %2773 = dma.done.wait [#allocation9], 4112  }
  0x5b   :  { %2774 = vsyncadd [#allocation9], 4294963184  ;;  %v2311_v0 = vld [vmem:[#allocation5 + $0x4] ss:$16 sps:$4 sm:$0xff]   ;;  %v2313_v1 = vld [vmem:[#allocation5 + $0xc] ss:$16 sps:$4 sm:$0xff]  }
  0x5c   :  { %1300 = vmatprep.subr.bf16.mxu0 %v2311_v0  ;;  %v2315_v2 = vld [vmem:[#allocation5] ss:$16 sps:$4 sm:$0xff]   ;;  %v2316_v3 = vld [vmem:[#allocation5 + $0x8] ss:$16 sps:$4 sm:$0xff]   ;;  %1464 = vmatprep.subr.bf16.mxu1 %v2313_v1  ;;  %v2317_v4 = vld [vmem:[#allocation5 + $0x24] ss:$16 sps:$4 sm:$0xff]  }
  0x5d   :  { %1301 = vmatpush1.bf16.msra.mxu0 %v2315_v2  ;;  %1465 = vmatpush1.bf16.msra.mxu1 %v2316_v3  ;;  %v2319_v5 = vld [vmem:[#allocation5 + $0x2c] ss:$16 sps:$4 sm:$0xff]   ;;  %v2321_v6 = vld [vmem:[#allocation5 + $0x20] ss:$16 sps:$4 sm:$0xff]   ;;  %v2322_v7 = vld [vmem:[#allocation5 + $0x28] ss:$16 sps:$4 sm:$0xff]  }
  0x5e   :  { %1302 = vmatprep.subr.bf16.mxu0 %v2317_v4  ;;  %1466 = vmatprep.subr.bf16.mxu1 %v2319_v5  ;;  %v2323_v8 = vld [vmem:[#allocation5 + $0x44] ss:$16 sps:$4 sm:$0xff]   ;;  %v2325_v9 = vld [vmem:[#allocation5 + $0x4c] ss:$16 sps:$4 sm:$0xff]   ;;  %v2327_v10 = vld [vmem:[#allocation5 + $0x40] ss:$16 sps:$4 sm:$0xff]  }
  0x5f   :  { %v2328_v11 = vld [vmem:[#allocation5 + $0x48] ss:$16 sps:$4 sm:$0xff]   ;;  %v2329_v12 = vld [vmem:[#allocation5 + $0x64] ss:$16 sps:$4 sm:$0xff]   ;;  %v2331_v13 = vld [vmem:[#allocation5 + $0x6c] ss:$16 sps:$4 sm:$0xff]  }
  0x60   :  { %v2333_v14 = vld [vmem:[#allocation5 + $0x60] ss:$16 sps:$4 sm:$0xff]   ;;  %v2334_v15 = vld [vmem:[#allocation5 + $0x68] ss:$16 sps:$4 sm:$0xff]   ;;  %v2335_v16 = vld [vmem:[#allocation5 + $0x84] ss:$16 sps:$4 sm:$0xff]  }
  0x61   :  { %1303 = vmatpush1.bf16.msra.mxu0 %v2321_v6  ;;  %1467 = vmatpush1.bf16.msra.mxu1 %v2322_v7  ;;  %v2337_v17 = vld [vmem:[#allocation5 + $0x8c] ss:$16 sps:$4 sm:$0xff]   ;;  %v2339_v18 = vld [vmem:[#allocation5 + $0x80] ss:$16 sps:$4 sm:$0xff]   ;;  %v2340_v19 = vld [vmem:[#allocation5 + $0x88] ss:$16 sps:$4 sm:$0xff]  }
  0x62   :  { %1304 = vmatprep.subr.bf16.mxu0 %v2323_v8  ;;  %1468 = vmatprep.subr.bf16.mxu1 %v2325_v9  ;;  %v2341_v20 = vld [vmem:[#allocation5 + $0xa4] ss:$16 sps:$4 sm:$0xff]   ;;  %v2343_v21 = vld [vmem:[#allocation5 + $0xac] ss:$16 sps:$4 sm:$0xff]   ;;  %v2345_v22 = vld [vmem:[#allocation5 + $0xa0] ss:$16 sps:$4 sm:$0xff]  }
  0x63   :  { %v2346_v23 = vld [vmem:[#allocation5 + $0xa8] ss:$16 sps:$4 sm:$0xff]   ;;  %v2347_v24 = vld [vmem:[#allocation5 + $0xc4] ss:$16 sps:$4 sm:$0xff]   ;;  %v2349_v25 = vld [vmem:[#allocation5 + $0xcc] ss:$16 sps:$4 sm:$0xff]  }
  0x64   :  { %v2351_v26 = vld [vmem:[#allocation5 + $0xc0] ss:$16 sps:$4 sm:$0xff]   ;;  %v2352_v27 = vld [vmem:[#allocation5 + $0xc8] ss:$16 sps:$4 sm:$0xff]   ;;  %v2353_v28 = vld [vmem:[#allocation5 + $0xe4] ss:$16 sps:$4 sm:$0xff]  }
  0x65   :  { %1305 = vmatpush1.bf16.msra.mxu0 %v2327_v10  ;;  %1469 = vmatpush1.bf16.msra.mxu1 %v2328_v11  ;;  %v2355_v29 = vld [vmem:[#allocation5 + $0xec] ss:$16 sps:$4 sm:$0xff]   ;;  %v2357_v30 = vld [vmem:[#allocation5 + $0xe0] ss:$16 sps:$4 sm:$0xff]   ;;  %v2358_v31 = vld [vmem:[#allocation5 + $0xe8] ss:$16 sps:$4 sm:$0xff]  }
  0x66   :  { %1306 = vmatprep.subr.bf16.mxu0 %v2329_v12  ;;  %1470 = vmatprep.subr.bf16.mxu1 %v2331_v13  ;;  %v2359_v32 = vld [vmem:[#allocation5 + $0x104] ss:$16 sps:$4 sm:$0xff]   ;;  %v2361_v33 = vld [vmem:[#allocation5 + $0x10c] ss:$16 sps:$4 sm:$0xff]   ;;  %v2363_v34 = vld [vmem:[#allocation5 + $0x100] ss:$16 sps:$4 sm:$0xff]  }
  0x67   :  { %v2364_v35 = vld [vmem:[#allocation5 + $0x108] ss:$16 sps:$4 sm:$0xff]   ;;  %v2365_v36 = vld [vmem:[#allocation5 + $0x124] ss:$16 sps:$4 sm:$0xff]   ;;  %v2367_v37 = vld [vmem:[#allocation5 + $0x12c] ss:$16 sps:$4 sm:$0xff]  }
  0x68   :  { %v2369_v38 = vld [vmem:[#allocation5 + $0x120] ss:$16 sps:$4 sm:$0xff]   ;;  %v2370_v39 = vld [vmem:[#allocation5 + $0x128] ss:$16 sps:$4 sm:$0xff]   ;;  %v2371_v40 = vld [vmem:[#allocation5 + $0x144] ss:$16 sps:$4 sm:$0xff]  }
  0x69   :  { %1307 = vmatpush1.bf16.msra.mxu0 %v2333_v14  ;;  %1471 = vmatpush1.bf16.msra.mxu1 %v2334_v15  ;;  %v2373_v41 = vld [vmem:[#allocation5 + $0x14c] ss:$16 sps:$4 sm:$0xff]   ;;  %v2375_v42 = vld [vmem:[#allocation5 + $0x140] ss:$16 sps:$4 sm:$0xff]   ;;  %v2376_v43 = vld [vmem:[#allocation5 + $0x148] ss:$16 sps:$4 sm:$0xff]  }
  0x6a   :  { %1308 = vmatprep.subr.bf16.mxu0 %v2335_v16  ;;  %1472 = vmatprep.subr.bf16.mxu1 %v2337_v17  ;;  %v2377_v44 = vld [vmem:[#allocation5 + $0x164] ss:$16 sps:$4 sm:$0xff]   ;;  %v2379_v45 = vld [vmem:[#allocation5 + $0x16c] ss:$16 sps:$4 sm:$0xff]   ;;  %v2381_v47 = vld [vmem:[#allocation5 + $0x160] ss:$16 sps:$4 sm:$0xff]  }
  0x6b   :  { %v85_v46 = vld [vmem:[#allocation2 + $0x8] sm:$0xff]  ;;  %v2382_v49 = vld [vmem:[#allocation5 + $0x168] ss:$16 sps:$4 sm:$0xff]   ;;  %v2385_v51 = vld [vmem:[#allocation5 + $0x18c] ss:$16 sps:$4 sm:$0xff]   ;;  %vm1296_vm0 = vcmask 130048  }
  0x6c   :  { %v92_v48 = vpack.c.bf16 %v85_v46, %v85_v46  ;;  %v2383_v50 = vld [vmem:[#allocation5 + $0x184] ss:$16 sps:$4 sm:$0xff]   ;;  %v2387_v52 = vld [vmem:[#allocation5 + $0x180] ss:$16 sps:$4 sm:$0xff]   ;;  %v2388_v53 = vld [vmem:[#allocation5 + $0x188] ss:$16 sps:$4 sm:$0xff]  }
  0x6d   :  { %1309 = vmatpush1.bf16.msra.mxu0 %v2339_v18  ;;  %1473 = vmatpush1.bf16.msra.mxu1 %v2340_v19  ;;  %v2389_v54 = vld [vmem:[#allocation5 + $0x1a4] ss:$16 sps:$4 sm:$0xff]   ;;  %v2391_v55 = vld [vmem:[#allocation5 + $0x1ac] ss:$16 sps:$4 sm:$0xff]   ;;  %v2393_v56 = vld [vmem:[#allocation5 + $0x1a0] ss:$16 sps:$4 sm:$0xff]  }
  0x6e   :  { %1310 = vmatprep.subr.bf16.mxu0 %v2341_v20  ;;  %1474 = vmatprep.subr.bf16.mxu1 %v2343_v21  ;;  %v2394_v57 = vld [vmem:[#allocation5 + $0x1a8] ss:$16 sps:$4 sm:$0xff]   ;;  %v2395_v58 = vld [vmem:[#allocation5 + $0x1c4] ss:$16 sps:$4 sm:$0xff]   ;;  %v2397_v59 = vld [vmem:[#allocation5 + $0x1cc] ss:$16 sps:$4 sm:$0xff]  }
  0x6f   :  { %1332 = vmatprep.mubr.bf16.mxu0 %v92_v48  ;;  %1496 = vmatprep.mubr.bf16.mxu1 %v92_v48  ;;  %v2399_v60 = vld [vmem:[#allocation5 + $0x1c0] ss:$16 sps:$4 sm:$0xff]   ;;  %v2400_v61 = vld [vmem:[#allocation5 + $0x1c8] ss:$16 sps:$4 sm:$0xff]   ;;  %v2401_v62 = vld [vmem:[#allocation5 + $0x1e4] ss:$16 sps:$4 sm:$0xff]  }
  0x70   :  { %v2403_v63 = vld [vmem:[#allocation5 + $0x1ec] ss:$16 sps:$4 sm:$0xff]   ;;  %v2405_v0 = vld [vmem:[#allocation5 + $0x1e0] ss:$16 sps:$4 sm:$0xff]   ;;  %v2406_v1 = vld [vmem:[#allocation5 + $0x1e8] ss:$16 sps:$4 sm:$0xff]  }
  0x71   :  { %1311 = vmatpush1.bf16.msra.mxu0 %v2345_v22  ;;  %1475 = vmatpush1.bf16.msra.mxu1 %v2346_v23  ;;  %v84_v2 = vld [vmem:[#allocation2] sm:$0xff]  ;;  %v2409_v3 = vld [vmem:[#allocation5 + $0x204] ss:$16 sps:$4 sm:$0xff]   ;;  %v2407_v6 = vld [vmem:[#allocation5 + $0x200] ss:$16 sps:$4 sm:$0xff]   ;;  %s2787_s4 = smov [#allocation11]  }
  0x72   :  { %1312 = vmatprep.subr.bf16.mxu0 %v2347_v24  ;;  %1476 = vmatprep.subr.bf16.mxu1 %v2349_v25  ;;  %v2412_v4 = vld [vmem:[#allocation5 + $0x20c] ss:$16 sps:$4 sm:$0xff]   ;;  %v91_v5 = vpack.c.bf16 %v84_v2, %v84_v2  ;;  %v2410_v7 = vld [vmem:[#allocation5 + $0x208] ss:$16 sps:$4 sm:$0xff]   ;;  %v2415_v8 = vld [vmem:[#allocation5 + $0x224] ss:$16 sps:$4 sm:$0xff]  }
  0x73   :  { %v2418_v9 = vld [vmem:[#allocation5 + $0x22c] ss:$16 sps:$4 sm:$0xff]   ;;  %v2413_v10 = vld [vmem:[#allocation5 + $0x220] ss:$16 sps:$4 sm:$0xff]   ;;  %v2416_v11 = vld [vmem:[#allocation5 + $0x228] ss:$16 sps:$4 sm:$0xff]  }
  0x74   :  { %v2421_v12 = vld [vmem:[#allocation5 + $0x244] ss:$16 sps:$4 sm:$0xff]   ;;  %v2424_v13 = vld [vmem:[#allocation5 + $0x24c] ss:$16 sps:$4 sm:$0xff]   ;;  %v2419_v14 = vld [vmem:[#allocation5 + $0x240] ss:$16 sps:$4 sm:$0xff]  }
  0x75   :  { %1313 = vmatpush1.bf16.msra.mxu0 %v2351_v26  ;;  %1477 = vmatpush1.bf16.msra.mxu1 %v2352_v27  ;;  %v2422_v15 = vld [vmem:[#allocation5 + $0x248] ss:$16 sps:$4 sm:$0xff]   ;;  %v2427_v16 = vld [vmem:[#allocation5 + $0x264] ss:$16 sps:$4 sm:$0xff]   ;;  %v2430_v17 = vld [vmem:[#allocation5 + $0x26c] ss:$16 sps:$4 sm:$0xff]  }
  0x76   :  { %1314 = vmatprep.subr.bf16.mxu0 %v2353_v28  ;;  %1478 = vmatprep.subr.bf16.mxu1 %v2355_v29  ;;  %v2425_v18 = vld [vmem:[#allocation5 + $0x260] ss:$16 sps:$4 sm:$0xff]   ;;  %v2428_v19 = vld [vmem:[#allocation5 + $0x268] ss:$16 sps:$4 sm:$0xff]   ;;  %v2433_v20 = vld [vmem:[#allocation5 + $0x284] ss:$16 sps:$4 sm:$0xff]  }
  0x77   :  { %v2436_v21 = vld [vmem:[#allocation5 + $0x28c] ss:$16 sps:$4 sm:$0xff]   ;;  %v2431_v22 = vld [vmem:[#allocation5 + $0x280] ss:$16 sps:$4 sm:$0xff]   ;;  %v2434_v23 = vld [vmem:[#allocation5 + $0x288] ss:$16 sps:$4 sm:$0xff]  }
  0x78   :  { %v2439_v24 = vld [vmem:[#allocation5 + $0x2a4] ss:$16 sps:$4 sm:$0xff]   ;;  %v2442_v25 = vld [vmem:[#allocation5 + $0x2ac] ss:$16 sps:$4 sm:$0xff]   ;;  %v2437_v26 = vld [vmem:[#allocation5 + $0x2a0] ss:$16 sps:$4 sm:$0xff]  }
  0x79   :  { %1315 = vmatpush1.bf16.msra.mxu0 %v2357_v30  ;;  %1479 = vmatpush1.bf16.msra.mxu1 %v2358_v31  ;;  %v2440_v27 = vld [vmem:[#allocation5 + $0x2a8] ss:$16 sps:$4 sm:$0xff]   ;;  %v2445_v28 = vld [vmem:[#allocation5 + $0x2c4] ss:$16 sps:$4 sm:$0xff]   ;;  %v2448_v29 = vld [vmem:[#allocation5 + $0x2cc] ss:$16 sps:$4 sm:$0xff]  }
  0x7a   :  { %1316 = vmatprep.subr.bf16.mxu0 %v2359_v32  ;;  %1480 = vmatprep.subr.bf16.mxu1 %v2361_v33  ;;  %v87_v30 = vld [vmem:[#allocation2 + $0x18] sm:$0xff]  ;;  %v2446_v33 = vld [vmem:[#allocation5 + $0x2c8] ss:$16 sps:$4 sm:$0xff]   ;;  %s1986_s28 = sshll.u32 %s2787_s4, 4  ;;  %s1987_s28 = int_to_ptr.vmem [resolvable:$true] %s1986_s28 }
  0x7b   :  { %v2443_v31 = vld [vmem:[#allocation5 + $0x2c0] ss:$16 sps:$4 sm:$0xff]   ;;  %v94_v32 = vpack.c.bf16 %v87_v30, %v87_v30  ;;  %v2469_v46 = vld [vmem:[#allocation5 + $0x344] ss:$16 sps:$4 sm:$0xff]   ;;  %s2747_s29 = scalar_lea.vmem %s1987_s28, 128  ;;  %p2752_p13 = scmp.lt.s32.totalorder %s1987_s28, %s1987_s28 }
  0x7c   :  { %v2467_v48 = vld [vmem:[#allocation5 + $0x340] ss:$16 sps:$4 sm:$0xff]   ;;  %v2499_v2 = vld [vmem:[#allocation5 + $0x3e4] ss:$16 sps:$4 sm:$0xff]   ;;  %p2748_p12 = scmp.ne.s32.totalorder %s1987_s28, %s2747_s29  ;;  %p2753_p0 = scmp.lt.s32.totalorder %s2747_s29, %s2747_s29 }
  0x7d   :  { %1317 = vmatpush1.bf16.msra.mxu0 %v2363_v34  ;;  %1481 = vmatpush1.bf16.msra.mxu1 %v2364_v35  ;;  %v2451_v34 = vld [vmem:[#allocation5 + $0x2e4] ss:$16 sps:$4 sm:$0xff]   ;;  %v2454_v35 = vld [vmem:[#allocation5 + $0x2ec] ss:$16 sps:$4 sm:$0xff]  }
  0x7e   :  { %1318 = vmatprep.subr.bf16.mxu0 %v2365_v36  ;;  %1482 = vmatprep.subr.bf16.mxu1 %v2367_v37  ;;  %v2449_v36 = vld [vmem:[#allocation5 + $0x2e0] ss:$16 sps:$4 sm:$0xff]   ;;  %v2452_v37 = vld [vmem:[#allocation5 + $0x2e8] ss:$16 sps:$4 sm:$0xff]   ;;  %v2535_v30 = vld [vmem:[#allocation5 + $0x4a4] ss:$16 sps:$4 sm:$0xff]   ;;  %p2754_p1 = por %p2753_p0, %p2752_p13 }
  0x80   :  { %p2755_p2 = pnand %p2754_p1, %p2748_p12 }
  0x81   :  { %1319 = vmatpush1.bf16.msra.mxu0 %v2369_v38  ;;  %1483 = vmatpush1.bf16.msra.mxu1 %v2370_v39  ;;  %v2457_v38 = vld [vmem:[#allocation5 + $0x304] ss:$16 sps:$4 sm:$0xff]   ;;  %v2460_v39 = vld [vmem:[#allocation5 + $0x30c] ss:$16 sps:$4 sm:$0xff]  }
  0x82   :  { %1320 = vmatprep.subr.bf16.mxu0 %v2371_v40  ;;  %1484 = vmatprep.subr.bf16.mxu1 %v2373_v41  ;;  %v2455_v40 = vld [vmem:[#allocation5 + $0x300] ss:$16 sps:$4 sm:$0xff]   ;;  %v2458_v41 = vld [vmem:[#allocation5 + $0x308] ss:$16 sps:$4 sm:$0xff]  }
  0x85   :  { %1321 = vmatpush1.bf16.msra.mxu0 %v2375_v42  ;;  %1485 = vmatpush1.bf16.msra.mxu1 %v2376_v43  ;;  %v2463_v42 = vld [vmem:[#allocation5 + $0x324] ss:$16 sps:$4 sm:$0xff]   ;;  %v2466_v43 = vld [vmem:[#allocation5 + $0x32c] ss:$16 sps:$4 sm:$0xff]  }
  0x86   :  { %1322 = vmatprep.subr.bf16.mxu0 %v2377_v44  ;;  %1486 = vmatprep.subr.bf16.mxu1 %v2379_v45  ;;  %v2461_v44 = vld [vmem:[#allocation5 + $0x320] ss:$16 sps:$4 sm:$0xff]   ;;  %v2464_v45 = vld [vmem:[#allocation5 + $0x328] ss:$16 sps:$4 sm:$0xff]  }
  0x89   :  { %1323 = vmatpush1.bf16.msra.mxu0 %v2381_v47  ;;  %1487 = vmatpush1.bf16.msra.mxu1 %v2382_v49  ;;  %v2472_v47 = vld [vmem:[#allocation5 + $0x34c] ss:$16 sps:$4 sm:$0xff]   ;;  %v2470_v49 = vld [vmem:[#allocation5 + $0x348] ss:$16 sps:$4 sm:$0xff]  }
  0x8a   :  { %1324 = vmatprep.subr.bf16.mxu0 %v2383_v50  ;;  %1488 = vmatprep.subr.bf16.mxu1 %v2385_v51  ;;  %v2475_v50 = vld [vmem:[#allocation5 + $0x364] ss:$16 sps:$4 sm:$0xff]   ;;  %v2478_v51 = vld [vmem:[#allocation5 + $0x36c] ss:$16 sps:$4 sm:$0xff]  }
  0x8d   :  { %1325 = vmatpush1.bf16.msra.mxu0 %v2387_v52  ;;  %1489 = vmatpush1.bf16.msra.mxu1 %v2388_v53  ;;  %v2473_v52 = vld [vmem:[#allocation5 + $0x360] ss:$16 sps:$4 sm:$0xff]   ;;  %v2476_v53 = vld [vmem:[#allocation5 + $0x368] ss:$16 sps:$4 sm:$0xff]  }
  0x8e   :  { %1326 = vmatprep.subr.bf16.mxu0 %v2389_v54  ;;  %1490 = vmatprep.subr.bf16.mxu1 %v2391_v55  ;;  %v2481_v54 = vld [vmem:[#allocation5 + $0x384] ss:$16 sps:$4 sm:$0xff]   ;;  %v2484_v55 = vld [vmem:[#allocation5 + $0x38c] ss:$16 sps:$4 sm:$0xff]  }
  0x91   :  { %1327 = vmatpush1.bf16.msra.mxu0 %v2393_v56  ;;  %1491 = vmatpush1.bf16.msra.mxu1 %v2394_v57  ;;  %v2479_v56 = vld [vmem:[#allocation5 + $0x380] ss:$16 sps:$4 sm:$0xff]   ;;  %v2482_v57 = vld [vmem:[#allocation5 + $0x388] ss:$16 sps:$4 sm:$0xff]  }
  0x92   :  { %1328 = vmatprep.subr.bf16.mxu0 %v2395_v58  ;;  %1492 = vmatprep.subr.bf16.mxu1 %v2397_v59  ;;  %v2487_v58 = vld [vmem:[#allocation5 + $0x3a4] ss:$16 sps:$4 sm:$0xff]   ;;  %v2490_v59 = vld [vmem:[#allocation5 + $0x3ac] ss:$16 sps:$4 sm:$0xff]  }
  0x95   :  { %1329 = vmatpush1.bf16.msra.mxu0 %v2399_v60  ;;  %1493 = vmatpush1.bf16.msra.mxu1 %v2400_v61  ;;  %v2485_v60 = vld [vmem:[#allocation5 + $0x3a0] ss:$16 sps:$4 sm:$0xff]   ;;  %v2488_v61 = vld [vmem:[#allocation5 + $0x3a8] ss:$16 sps:$4 sm:$0xff]  }
  0x96   :  { %1330 = vmatprep.subr.bf16.mxu0 %v2401_v62  ;;  %1494 = vmatprep.subr.bf16.mxu1 %v2403_v63  ;;  %v2493_v62 = vld [vmem:[#allocation5 + $0x3c4] ss:$16 sps:$4 sm:$0xff]   ;;  %v2496_v63 = vld [vmem:[#allocation5 + $0x3cc] ss:$16 sps:$4 sm:$0xff]  }
  0x99   :  { %1331 = vmatpush1.bf16.msra.mxu0 %v2405_v0  ;;  %1495 = vmatpush1.bf16.msra.mxu1 %v2406_v1  ;;  %v2491_v0 = vld [vmem:[#allocation5 + $0x3c0] ss:$16 sps:$4 sm:$0xff]   ;;  %v2494_v1 = vld [vmem:[#allocation5 + $0x3c8] ss:$16 sps:$4 sm:$0xff]  }
  0x9a   :  { %1341 = vmatprep.subr.bf16.mxu0 %v2409_v3  ;;  %1505 = vmatprep.subr.bf16.mxu1 %v2412_v4  ;;  %v2502_v3 = vld [vmem:[#allocation5 + $0x3ec] ss:$16 sps:$4 sm:$0xff]   ;;  %v2497_v4 = vld [vmem:[#allocation5 + $0x3e0] ss:$16 sps:$4 sm:$0xff]  }
  0x9c   :  { %1333 = vmatmul.mubr.bf16.vlgmr.msra.gmra.mrb[0].mxu0 %v91_v5  ;;  %1497 = vmatmul.mubr.bf16.vlgmr.msra.gmra.mrb[0].mxu1 %v91_v5  ;;  %v2500_v5 = vld [vmem:[#allocation5 + $0x3e8] ss:$16 sps:$4 sm:$0xff]  }
  0x9d   :  { %1342 = vmatpush1.bf16.msra.mxu0 %v2407_v6  ;;  %1506 = vmatpush1.bf16.msra.mxu1 %v2410_v7  ;;  %v2505_v6 = vld [vmem:[#allocation5 + $0x404] ss:$16 sps:$4 sm:$0xff]   ;;  %v86_v7 = vld [vmem:[#allocation2 + $0x10] sm:$0xff] }
  0x9e   :  { %1343 = vmatprep.subr.bf16.mxu0 %v2415_v8  ;;  %1507 = vmatprep.subr.bf16.mxu1 %v2418_v9  ;;  %v2508_v8 = vld [vmem:[#allocation5 + $0x40c] ss:$16 sps:$4 sm:$0xff]   ;;  %v2503_v9 = vld [vmem:[#allocation5 + $0x400] ss:$16 sps:$4 sm:$0xff]  }
  0x9f   :  { %1373 = vmatprep.mubr.bf16.mxu0 %v94_v32  ;;  %1537 = vmatprep.mubr.bf16.mxu1 %v94_v32  ;;  %v2533_v32 = vld [vmem:[#allocation5 + $0x4a0] ss:$16 sps:$4 sm:$0xff]  }
  0xa1   :  { %1344 = vmatpush1.bf16.msra.mxu0 %v2413_v10  ;;  %1508 = vmatpush1.bf16.msra.mxu1 %v2416_v11  ;;  %v93_v10 = vpack.c.bf16 %v86_v7, %v86_v7  ;;  %v2506_v11 = vld [vmem:[#allocation5 + $0x408] ss:$16 sps:$4 sm:$0xff]   ;;  %v2598_v7 = vld [vmem:[#allocation5 + $0x5ec] ss:$16 sps:$4 sm:$0xff]  }
  0xa2   :  { %1345 = vmatprep.subr.bf16.mxu0 %v2421_v12  ;;  %1509 = vmatprep.subr.bf16.mxu1 %v2424_v13  ;;  %v2511_v12 = vld [vmem:[#allocation5 + $0x424] ss:$16 sps:$4 sm:$0xff]   ;;  %v2514_v13 = vld [vmem:[#allocation5 + $0x42c] ss:$16 sps:$4 sm:$0xff]  }
  0xa5   :  { %1346 = vmatpush1.bf16.msra.mxu0 %v2419_v14  ;;  %1510 = vmatpush1.bf16.msra.mxu1 %v2422_v15  ;;  %v89_v14 = vld [vmem:[#allocation2 + $0x28] sm:$0xff] }
  0xa6   :  { %1347 = vmatprep.subr.bf16.mxu0 %v2427_v16  ;;  %1511 = vmatprep.subr.bf16.mxu1 %v2430_v17  ;;  %v96_v15 = vpack.c.bf16 %v89_v14, %v89_v14  ;;  %v2509_v16 = vld [vmem:[#allocation5 + $0x420] ss:$16 sps:$4 sm:$0xff]   ;;  %v2512_v17 = vld [vmem:[#allocation5 + $0x428] ss:$16 sps:$4 sm:$0xff]  }
  0xa7   :  { %v2599_v14 = vld [vmem:[#allocation5 + $0x600] ss:$16 sps:$4 sm:$0xff]  }
  0xa9   :  { %1348 = vmatpush1.bf16.msra.mxu0 %v2425_v18  ;;  %1512 = vmatpush1.bf16.msra.mxu1 %v2428_v19  ;;  %v2517_v18 = vld [vmem:[#allocation5 + $0x444] ss:$16 sps:$4 sm:$0xff]   ;;  %v2520_v19 = vld [vmem:[#allocation5 + $0x44c] ss:$16 sps:$4 sm:$0xff]  }
  0xaa   :  { %1349 = vmatprep.subr.bf16.mxu0 %v2433_v20  ;;  %1513 = vmatprep.subr.bf16.mxu1 %v2436_v21  ;;  %v2515_v20 = vld [vmem:[#allocation5 + $0x440] ss:$16 sps:$4 sm:$0xff]   ;;  %v2518_v21 = vld [vmem:[#allocation5 + $0x448] ss:$16 sps:$4 sm:$0xff]  }
  0xad   :  { %1350 = vmatpush1.bf16.msra.mxu0 %v2431_v22  ;;  %1514 = vmatpush1.bf16.msra.mxu1 %v2434_v23  ;;  %v2523_v22 = vld [vmem:[#allocation5 + $0x464] ss:$16 sps:$4 sm:$0xff]   ;;  %v2526_v23 = vld [vmem:[#allocation5 + $0x46c] ss:$16 sps:$4 sm:$0xff]  }
  0xae   :  { %1351 = vmatprep.subr.bf16.mxu0 %v2439_v24  ;;  %1515 = vmatprep.subr.bf16.mxu1 %v2442_v25  ;;  %v2521_v24 = vld [vmem:[#allocation5 + $0x460] ss:$16 sps:$4 sm:$0xff]   ;;  %v2524_v25 = vld [vmem:[#allocation5 + $0x468] ss:$16 sps:$4 sm:$0xff]  }
  0xb1   :  { %1352 = vmatpush1.bf16.msra.mxu0 %v2437_v26  ;;  %1516 = vmatpush1.bf16.msra.mxu1 %v2440_v27  ;;  %v2529_v26 = vld [vmem:[#allocation5 + $0x484] ss:$16 sps:$4 sm:$0xff]   ;;  %v2532_v27 = vld [vmem:[#allocation5 + $0x48c] ss:$16 sps:$4 sm:$0xff]  }
  0xb2   :  { %1353 = vmatprep.subr.bf16.mxu0 %v2445_v28  ;;  %1517 = vmatprep.subr.bf16.mxu1 %v2448_v29  ;;  %v2527_v28 = vld [vmem:[#allocation5 + $0x480] ss:$16 sps:$4 sm:$0xff]   ;;  %v2530_v29 = vld [vmem:[#allocation5 + $0x488] ss:$16 sps:$4 sm:$0xff]  }
  0xb5   :  { %1354 = vmatpush1.bf16.msra.mxu0 %v2443_v31  ;;  %1518 = vmatpush1.bf16.msra.mxu1 %v2446_v33  ;;  %v2538_v31 = vld [vmem:[#allocation5 + $0x4ac] ss:$16 sps:$4 sm:$0xff]   ;;  %v2536_v33 = vld [vmem:[#allocation5 + $0x4a8] ss:$16 sps:$4 sm:$0xff]  }
  0xb6   :  { %1355 = vmatprep.subr.bf16.mxu0 %v2451_v34  ;;  %1519 = vmatprep.subr.bf16.mxu1 %v2454_v35  ;;  %v2541_v34 = vld [vmem:[#allocation5 + $0x4c4] ss:$16 sps:$4 sm:$0xff]   ;;  %v2544_v35 = vld [vmem:[#allocation5 + $0x4cc] ss:$16 sps:$4 sm:$0xff]  }
  0xb9   :  { %1356 = vmatpush1.bf16.msra.mxu0 %v2449_v36  ;;  %1520 = vmatpush1.bf16.msra.mxu1 %v2452_v37  ;;  %v2539_v36 = vld [vmem:[#allocation5 + $0x4c0] ss:$16 sps:$4 sm:$0xff]   ;;  %v2542_v37 = vld [vmem:[#allocation5 + $0x4c8] ss:$16 sps:$4 sm:$0xff]  }
  0xba   :  { %1357 = vmatprep.subr.bf16.mxu0 %v2457_v38  ;;  %1521 = vmatprep.subr.bf16.mxu1 %v2460_v39  ;;  %v2547_v38 = vld [vmem:[#allocation5 + $0x4e4] ss:$16 sps:$4 sm:$0xff]   ;;  %v2550_v39 = vld [vmem:[#allocation5 + $0x4ec] ss:$16 sps:$4 sm:$0xff]  }
  0xbd   :  { %1358 = vmatpush1.bf16.msra.mxu0 %v2455_v40  ;;  %1522 = vmatpush1.bf16.msra.mxu1 %v2458_v41  ;;  %v2545_v40 = vld [vmem:[#allocation5 + $0x4e0] ss:$16 sps:$4 sm:$0xff]   ;;  %v2548_v41 = vld [vmem:[#allocation5 + $0x4e8] ss:$16 sps:$4 sm:$0xff]  }
  0xbe   :  { %1359 = vmatprep.subr.bf16.mxu0 %v2463_v42  ;;  %1523 = vmatprep.subr.bf16.mxu1 %v2466_v43  ;;  %v2553_v42 = vld [vmem:[#allocation5 + $0x504] ss:$16 sps:$4 sm:$0xff]   ;;  %v2556_v43 = vld [vmem:[#allocation5 + $0x50c] ss:$16 sps:$4 sm:$0xff]  }
  0xc1   :  { %1360 = vmatpush1.bf16.msra.mxu0 %v2461_v44  ;;  %1524 = vmatpush1.bf16.msra.mxu1 %v2464_v45  ;;  %v2551_v44 = vld [vmem:[#allocation5 + $0x500] ss:$16 sps:$4 sm:$0xff]   ;;  %v2554_v45 = vld [vmem:[#allocation5 + $0x508] ss:$16 sps:$4 sm:$0xff]  }
  0xc2   :  { %1361 = vmatprep.subr.bf16.mxu0 %v2469_v46  ;;  %1525 = vmatprep.subr.bf16.mxu1 %v2472_v47  ;;  %v2559_v46 = vld [vmem:[#allocation5 + $0x524] ss:$16 sps:$4 sm:$0xff]   ;;  %v2562_v47 = vld [vmem:[#allocation5 + $0x52c] ss:$16 sps:$4 sm:$0xff]  }
  0xc5   :  { %1362 = vmatpush1.bf16.msra.mxu0 %v2467_v48  ;;  %1526 = vmatpush1.bf16.msra.mxu1 %v2470_v49  ;;  %v2557_v48 = vld [vmem:[#allocation5 + $0x520] ss:$16 sps:$4 sm:$0xff]   ;;  %v2560_v49 = vld [vmem:[#allocation5 + $0x528] ss:$16 sps:$4 sm:$0xff]  }
  0xc6   :  { %1363 = vmatprep.subr.bf16.mxu0 %v2475_v50  ;;  %1527 = vmatprep.subr.bf16.mxu1 %v2478_v51  ;;  %v2565_v50 = vld [vmem:[#allocation5 + $0x544] ss:$16 sps:$4 sm:$0xff]   ;;  %v2568_v51 = vld [vmem:[#allocation5 + $0x54c] ss:$16 sps:$4 sm:$0xff]  }
  0xc9   :  { %1364 = vmatpush1.bf16.msra.mxu0 %v2473_v52  ;;  %1528 = vmatpush1.bf16.msra.mxu1 %v2476_v53  ;;  %v2563_v52 = vld [vmem:[#allocation5 + $0x540] ss:$16 sps:$4 sm:$0xff]   ;;  %v2566_v53 = vld [vmem:[#allocation5 + $0x548] ss:$16 sps:$4 sm:$0xff]  }
  0xca   :  { %1365 = vmatprep.subr.bf16.mxu0 %v2481_v54  ;;  %1529 = vmatprep.subr.bf16.mxu1 %v2484_v55  ;;  %v2571_v54 = vld [vmem:[#allocation5 + $0x564] ss:$16 sps:$4 sm:$0xff]   ;;  %v2574_v55 = vld [vmem:[#allocation5 + $0x56c] ss:$16 sps:$4 sm:$0xff]  }
  0xcd   :  { %1366 = vmatpush1.bf16.msra.mxu0 %v2479_v56  ;;  %1530 = vmatpush1.bf16.msra.mxu1 %v2482_v57  ;;  %v2569_v56 = vld [vmem:[#allocation5 + $0x560] ss:$16 sps:$4 sm:$0xff]   ;;  %v2572_v57 = vld [vmem:[#allocation5 + $0x568] ss:$16 sps:$4 sm:$0xff]  }
  0xce   :  { %1367 = vmatprep.subr.bf16.mxu0 %v2487_v58  ;;  %1531 = vmatprep.subr.bf16.mxu1 %v2490_v59  ;;  %v2577_v58 = vld [vmem:[#allocation5 + $0x584] ss:$16 sps:$4 sm:$0xff]   ;;  %v2580_v59 = vld [vmem:[#allocation5 + $0x58c] ss:$16 sps:$4 sm:$0xff]  }
  0xd1   :  { %1368 = vmatpush1.bf16.msra.mxu0 %v2485_v60  ;;  %1532 = vmatpush1.bf16.msra.mxu1 %v2488_v61  ;;  %v2575_v60 = vld [vmem:[#allocation5 + $0x580] ss:$16 sps:$4 sm:$0xff]   ;;  %v2578_v61 = vld [vmem:[#allocation5 + $0x588] ss:$16 sps:$4 sm:$0xff]  }
  0xd2   :  { %1369 = vmatprep.subr.bf16.mxu0 %v2493_v62  ;;  %1533 = vmatprep.subr.bf16.mxu1 %v2496_v63  ;;  %v2583_v62 = vld [vmem:[#allocation5 + $0x5a4] ss:$16 sps:$4 sm:$0xff]   ;;  %v2586_v63 = vld [vmem:[#allocation5 + $0x5ac] ss:$16 sps:$4 sm:$0xff]  }
  0xd5   :  { %1370 = vmatpush1.bf16.msra.mxu0 %v2491_v0  ;;  %1534 = vmatpush1.bf16.msra.mxu1 %v2494_v1  ;;  %v2581_v0 = vld [vmem:[#allocation5 + $0x5a0] ss:$16 sps:$4 sm:$0xff]   ;;  %v2584_v1 = vld [vmem:[#allocation5 + $0x5a8] ss:$16 sps:$4 sm:$0xff]  }
  0xd6   :  { %1371 = vmatprep.subr.bf16.mxu0 %v2499_v2  ;;  %1535 = vmatprep.subr.bf16.mxu1 %v2502_v3  ;;  %v2589_v2 = vld [vmem:[#allocation5 + $0x5c4] ss:$16 sps:$4 sm:$0xff]   ;;  %v2592_v3 = vld [vmem:[#allocation5 + $0x5cc] ss:$16 sps:$4 sm:$0xff]  }
  0xd9   :  { %1372 = vmatpush1.bf16.msra.mxu0 %v2497_v4  ;;  %1536 = vmatpush1.bf16.msra.mxu1 %v2500_v5  ;;  %v2587_v4 = vld [vmem:[#allocation5 + $0x5c0] ss:$16 sps:$4 sm:$0xff]   ;;  %v2590_v5 = vld [vmem:[#allocation5 + $0x5c8] ss:$16 sps:$4 sm:$0xff]  }
  0xda   :  { %1382 = vmatprep.subr.bf16.mxu0 %v2505_v6  ;;  %1546 = vmatprep.subr.bf16.mxu1 %v2508_v8  ;;  %v2595_v6 = vld [vmem:[#allocation5 + $0x5e4] ss:$16 sps:$4 sm:$0xff]   ;;  %v2593_v8 = vld [vmem:[#allocation5 + $0x5e0] ss:$16 sps:$4 sm:$0xff]  }
  0xdc   :  { %1374 = vmatmul.mubr.bf16.vlgmr.msra.gmra.mrb[0].mxu0 %v93_v10  ;;  %1538 = vmatmul.mubr.bf16.vlgmr.msra.gmra.mrb[0].mxu1 %v93_v10  ;;  %v88_v10 = vld [vmem:[#allocation2 + $0x20] sm:$0xff] }
  0xdd   :  { %1383 = vmatpush1.bf16.msra.mxu0 %v2503_v9  ;;  %1547 = vmatpush1.bf16.msra.mxu1 %v2506_v11  ;;  %v2596_v9 = vld [vmem:[#allocation5 + $0x5e8] ss:$16 sps:$4 sm:$0xff]   ;;  %v2601_v11 = vld [vmem:[#allocation5 + $0x604] ss:$16 sps:$4 sm:$0xff]  }
  0xde   :  { %1384 = vmatprep.subr.bf16.mxu0 %v2511_v12  ;;  %1548 = vmatprep.subr.bf16.mxu1 %v2514_v13  ;;  %v2604_v12 = vld [vmem:[#allocation5 + $0x60c] ss:$16 sps:$4 sm:$0xff]   ;;  %v95_v13 = vpack.c.bf16 %v88_v10, %v88_v10 }
  0xdf   :  { %1414 = vmatprep.mubr.bf16.mxu0 %v96_v15  ;;  %1578 = vmatprep.mubr.bf16.mxu1 %v96_v15  ;;  %v2602_v15 = vld [vmem:[#allocation5 + $0x608] ss:$16 sps:$4 sm:$0xff]  }
  0xe1   :  { %1385 = vmatpush1.bf16.msra.mxu0 %v2509_v16  ;;  %1549 = vmatpush1.bf16.msra.mxu1 %v2512_v17  ;;  %v2605_v16 = vld [vmem:[#allocation8 + $0x40] sm:$0xff]  }
  0xe2   :  { %1386 = vmatprep.subr.bf16.mxu0 %v2517_v18  ;;  %1550 = vmatprep.subr.bf16.mxu1 %v2520_v19  ;;  %v2606_v17 = vld [vmem:[#allocation8 + $0xc0] sm:$0xff]   ;;  %v2786_v18 = vmov 0   ;;  %v90_v19 = vld [vmem:[#allocation2 + $0x30] sm:$0xff] }
  0xe5   :  { %1387 = vmatpush1.bf16.msra.mxu0 %v2515_v20  ;;  %1551 = vmatpush1.bf16.msra.mxu1 %v2518_v21  ;;  %v97_v20 = vpack.c.bf16 %v90_v19, %v90_v19  ;;  %v2607_v21 = vld [vmem:[#allocation8] sm:$0xff]  }
  0xe6   :  { %1388 = vmatprep.subr.bf16.mxu0 %v2523_v22  ;;  %1552 = vmatprep.subr.bf16.mxu1 %v2526_v23  ;;  %v2608_v22 = vld [vmem:[#allocation8 + $0x80] sm:$0xff]   ;;  %v2609_v23 = vld [vmem:[#allocation8 + $0x48] sm:$0xff]  }
  0xe9   :  { %1389 = vmatpush1.bf16.msra.mxu0 %v2521_v24  ;;  %1553 = vmatpush1.bf16.msra.mxu1 %v2524_v25  ;;  %v2610_v24 = vld [vmem:[#allocation8 + $0xc8] sm:$0xff]  }
  0xea   :  { %1390 = vmatprep.subr.bf16.mxu0 %v2529_v26  ;;  %1554 = vmatprep.subr.bf16.mxu1 %v2532_v27  ;;  %v2611_v25 = vld [vmem:[#allocation8 + $0x8] sm:$0xff]   ;;  %v2613_v27 = vld [vmem:[#allocation8 + $0x50] sm:$0xff]  }
  0xeb   :  { %v2612_v26 = vld [vmem:[#allocation8 + $0x88] sm:$0xff]  }
  0xed   :  { %1391 = vmatpush1.bf16.msra.mxu0 %v2527_v28  ;;  %1555 = vmatpush1.bf16.msra.mxu1 %v2530_v29  ;;  %v2614_v28 = vld [vmem:[#allocation8 + $0xd0] sm:$0xff]  }
  0xee   :  { %1392 = vmatprep.subr.bf16.mxu0 %v2535_v30  ;;  %1556 = vmatprep.subr.bf16.mxu1 %v2538_v31  ;;  %v2615_v29 = vld [vmem:[#allocation8 + $0x10] sm:$0xff]   ;;  %v2617_v31 = vld [vmem:[#allocation8 + $0x58] sm:$0xff]  }
  0xef   :  { %v2616_v30 = vld [vmem:[#allocation8 + $0x90] sm:$0xff]  }
  0xf1   :  { %1393 = vmatpush1.bf16.msra.mxu0 %v2533_v32  ;;  %1557 = vmatpush1.bf16.msra.mxu1 %v2536_v33  ;;  %v2618_v32 = vld [vmem:[#allocation8 + $0xd8] sm:$0xff]  }
  0xf2   :  { %1394 = vmatprep.subr.bf16.mxu0 %v2541_v34  ;;  %1558 = vmatprep.subr.bf16.mxu1 %v2544_v35  ;;  %v2619_v33 = vld [vmem:[#allocation8 + $0x18] sm:$0xff]   ;;  %v2621_v35 = vld [vmem:[#allocation8 + $0x60] sm:$0xff]  }
  0xf3   :  { %v2620_v34 = vld [vmem:[#allocation8 + $0x98] sm:$0xff]  }
  0xf5   :  { %1395 = vmatpush1.bf16.msra.mxu0 %v2539_v36  ;;  %1559 = vmatpush1.bf16.msra.mxu1 %v2542_v37  ;;  %v2622_v36 = vld [vmem:[#allocation8 + $0xe0] sm:$0xff]  }
  0xf6   :  { %1396 = vmatprep.subr.bf16.mxu0 %v2547_v38  ;;  %1560 = vmatprep.subr.bf16.mxu1 %v2550_v39  ;;  %v2623_v37 = vld [vmem:[#allocation8 + $0x20] sm:$0xff]   ;;  %v2625_v39 = vld [vmem:[#allocation8 + $0x68] sm:$0xff]  }
  0xf7   :  { %v2624_v38 = vld [vmem:[#allocation8 + $0xa0] sm:$0xff]  }
  0xf9   :  { %1397 = vmatpush1.bf16.msra.mxu0 %v2545_v40  ;;  %1561 = vmatpush1.bf16.msra.mxu1 %v2548_v41  ;;  %v2626_v40 = vld [vmem:[#allocation8 + $0xe8] sm:$0xff]  }
  0xfa   :  { %1398 = vmatprep.subr.bf16.mxu0 %v2553_v42  ;;  %1562 = vmatprep.subr.bf16.mxu1 %v2556_v43  ;;  %v2627_v41 = vld [vmem:[#allocation8 + $0x28] sm:$0xff]   ;;  %v2629_v43 = vld [vmem:[#allocation8 + $0x70] sm:$0xff]  }
  0xfb   :  { %v2628_v42 = vld [vmem:[#allocation8 + $0xa8] sm:$0xff]  }
  0xfd   :  { %1399 = vmatpush1.bf16.msra.mxu0 %v2551_v44  ;;  %1563 = vmatpush1.bf16.msra.mxu1 %v2554_v45  ;;  %v2630_v44 = vld [vmem:[#allocation8 + $0xf0] sm:$0xff]  }
  0xfe   :  { %1400 = vmatprep.subr.bf16.mxu0 %v2559_v46  ;;  %1564 = vmatprep.subr.bf16.mxu1 %v2562_v47  ;;  %v2631_v45 = vld [vmem:[#allocation8 + $0x30] sm:$0xff]   ;;  %v2633_v47 = vld [vmem:[#allocation8 + $0x78] sm:$0xff]  }
  0xff   :  { %v2632_v46 = vld [vmem:[#allocation8 + $0xb0] sm:$0xff]  }
 0x101   :  { %1401 = vmatpush1.bf16.msra.mxu0 %v2557_v48  ;;  %1565 = vmatpush1.bf16.msra.mxu1 %v2560_v49  ;;  %v2634_v48 = vld [vmem:[#allocation8 + $0xf8] sm:$0xff]  }
 0x102   :  { %1402 = vmatprep.subr.bf16.mxu0 %v2565_v50  ;;  %1566 = vmatprep.subr.bf16.mxu1 %v2568_v51  ;;  %v2635_v49 = vld [vmem:[#allocation8 + $0x38] sm:$0xff]   ;;  %v296_v51 = vlaneseq }
 0x103   :  { %v2636_v50 = vld [vmem:[#allocation8 + $0xb8] sm:$0xff]  }
 0x105   :  { %1403 = vmatpush1.bf16.msra.mxu0 %v2563_v52  ;;  %1567 = vmatpush1.bf16.msra.mxu1 %v2566_v53  ;;  %v297_v52 = vshrl.u32 %v296_v51, 7 }
 0x106   :  { %1404 = vmatprep.subr.bf16.mxu0 %v2571_v54  ;;  %1568 = vmatprep.subr.bf16.mxu1 %v2574_v55  ;;  %v294_v55 = vld [vmem:[#allocation7] sm:$0xf] }
 0x107   :  { %v298_v53 = vsub.s32 0, %v297_v52  ;;  %v306_v54 = vsub.s32 2, %v297_v52 }
 0x109   :  { %1405 = vmatpush1.bf16.msra.mxu0 %v2569_v56  ;;  %1569 = vmatpush1.bf16.msra.mxu1 %v2572_v57  ;;  %v302_v56 = vsub.s32 1, %v297_v52  ;;  %v310_v57 = vsub.s32 3, %v297_v52 }
 0x10a   :  { %1406 = vmatprep.subr.bf16.mxu0 %v2577_v58  ;;  %1570 = vmatprep.subr.bf16.mxu1 %v2580_v59  ;;  %v299_v58 = vrot.slane %v294_v55, %v298_v53  ;;  %v307_v59 = vrot.slane %v294_v55, %v306_v54 }
 0x10d   :  { %1407 = vmatpush1.bf16.msra.mxu0 %v2575_v60  ;;  %1571 = vmatpush1.bf16.msra.mxu1 %v2578_v61  ;;  %v303_v60 = vrot.slane %v294_v55, %v302_v56  ;;  %v311_v61 = vrot.slane %v294_v55, %v310_v57 }
 0x10e   :  { %1408 = vmatprep.subr.bf16.mxu0 %v2583_v62  ;;  %1572 = vmatprep.subr.bf16.mxu1 %v2586_v63 }
 0x111   :  { %1409 = vmatpush1.bf16.msra.mxu0 %v2581_v0  ;;  %1573 = vmatpush1.bf16.msra.mxu1 %v2584_v1 }
 0x112   :  { %1410 = vmatprep.subr.bf16.mxu0 %v2589_v2  ;;  %1574 = vmatprep.subr.bf16.mxu1 %v2592_v3 }
 0x115   :  { %1411 = vmatpush1.bf16.msra.mxu0 %v2587_v4  ;;  %1575 = vmatpush1.bf16.msra.mxu1 %v2590_v5 }
 0x116   :  { %1412 = vmatprep.subr.bf16.mxu0 %v2595_v6  ;;  %1576 = vmatprep.subr.bf16.mxu1 %v2598_v7 }
 0x119   :  { %1413 = vmatpush1.bf16.msra.mxu0 %v2593_v8  ;;  %1577 = vmatpush1.bf16.msra.mxu1 %v2596_v9 }
 0x11a   :  { %1423 = vmatprep.subr.bf16.mxu0 %v2601_v11  ;;  %1587 = vmatprep.subr.bf16.mxu1 %v2604_v12 }
 0x11c   :  { %1415 = vmatmul.mubr.bf16.vlgmr.msra.gmra.mrb[0].mxu0 %v95_v13  ;;  %1579 = vmatmul.mubr.bf16.vlgmr.msra.gmra.mrb[0].mxu1 %v95_v13 }
 0x11d   :  { %1424 = vmatpush1.bf16.msra.mxu0 %v2599_v14  ;;  %1588 = vmatpush1.bf16.msra.mxu1 %v2602_v15 }
 0x11e   :  { %1455 = vmatprep.mubr.bf16.mxu0 %v2786_v18  ;;  %1619 = vmatprep.mubr.bf16.mxu1 %v2786_v18 }
 0x11f   :  { %2228 = vmatprep.subr.bf16.mxu0 %v2605_v16  ;;  %2250 = vmatprep.subr.bf16.mxu1 %v2606_v17 }
 0x128   :  { %2193 = vmatmul.mubr.msk.bf16.vlgmr.msra.gmra.mrb[0].mxu0 %vm1296_vm0, %v97_v20  ;;  %2194 = vmatmul.mubr.msk.bf16.vlgmr.msra.gmra.mrb[0].mxu1 %vm1296_vm0, %v97_v20  ;;  %v2195_v20 = vld [vmem:[#allocation10] ss:$0 sm:$0xff] }
 0x129   :  { %2229 = vmatpush3.bf16.msra.mxu0 %v2607_v21  ;;  %2251 = vmatpush3.bf16.msra.mxu1 %v2608_v22 }
 0x12a   :  { %2230 = vmatprep.subr.bf16.mxu0 %v2609_v23  ;;  %2252 = vmatprep.subr.bf16.mxu1 %v2610_v24 }
 0x12d   :  { %2231 = vmatpush3.bf16.msra.mxu0 %v2611_v25  ;;  %2253 = vmatpush3.bf16.msra.mxu1 %v2612_v26 }
 0x12e   :  { %2232 = vmatprep.subr.bf16.mxu0 %v2613_v27  ;;  %2254 = vmatprep.subr.bf16.mxu1 %v2614_v28 }
 0x131   :  { %2233 = vmatpush3.bf16.msra.mxu0 %v2615_v29  ;;  %2255 = vmatpush3.bf16.msra.mxu1 %v2616_v30 }
 0x132   :  { %2234 = vmatprep.subr.bf16.mxu0 %v2617_v31  ;;  %2256 = vmatprep.subr.bf16.mxu1 %v2618_v32 }
 0x135   :  { %2235 = vmatpush3.bf16.msra.mxu0 %v2619_v33  ;;  %2257 = vmatpush3.bf16.msra.mxu1 %v2620_v34 }
 0x136   :  { %2236 = vmatprep.subr.bf16.mxu0 %v2621_v35  ;;  %2258 = vmatprep.subr.bf16.mxu1 %v2622_v36 }
 0x139   :  { %2237 = vmatpush3.bf16.msra.mxu0 %v2623_v37  ;;  %2259 = vmatpush3.bf16.msra.mxu1 %v2624_v38 }
 0x13a   :  { %2238 = vmatprep.subr.bf16.mxu0 %v2625_v39  ;;  %2260 = vmatprep.subr.bf16.mxu1 %v2626_v40 }
 0x13d   :  { %2239 = vmatpush3.bf16.msra.mxu0 %v2627_v41  ;;  %2261 = vmatpush3.bf16.msra.mxu1 %v2628_v42 }
 0x13e   :  { %2240 = vmatprep.subr.bf16.mxu0 %v2629_v43  ;;  %2262 = vmatprep.subr.bf16.mxu1 %v2630_v44 }
 0x141   :  { %2241 = vmatpush3.bf16.msra.mxu0 %v2631_v45  ;;  %2263 = vmatpush3.bf16.msra.mxu1 %v2632_v46 }
 0x142   :  { %2242 = vmatprep.subr.bf16.mxu0 %v2633_v47  ;;  %2264 = vmatprep.subr.bf16.mxu1 %v2634_v48 }
 0x145   :  { %2243 = vmatpush3.bf16.msra.mxu0 %v2635_v49  ;;  %2265 = vmatpush3.bf16.msra.mxu1 %v2636_v50 }
 0x1fb   :  { %v1457_v62 = vpop.f32.mrb[0].mxu0  ;;  %v1621_v63 = vpop.f32.mrb[0].mxu1 }
 0x1fc   :  { %v2272_v0 = vadd.f32 %v1457_v62, %v299_v58  ;;  %v2274_v1 = vadd.f32 %v1621_v63, %v307_v59  ;;  %v1459_v2 = vpop.f32.mrb[1].mxu0  ;;  %v1623_v3 = vpop.f32.mrb[1].mxu1 }
 0x1fd   :  { %v2273_v4 = vadd.f32 %v1459_v2, %v303_v60  ;;  %v2275_v5 = vadd.f32 %v1623_v3, %v311_v61  ;;  %v1461_v6 = vpop.f32.mrb[2].mxu0  ;;  %v1625_v7 = vpop.f32.mrb[2].mxu1 }
 0x1fe   :  { %v1628_v8 = vmax.f32 %v2272_v0, 0.0  ;;  %v1630_v9 = vmax.f32 %v2274_v1, 0.0  ;;  %v1462_v10 = vpop.f32.mrb[3].mxu0  ;;  %v1626_v11 = vpop.f32.mrb[3].mxu1 }
 0x1ff   :  { %v1629_v12 = vmax.f32 %v2273_v4, 0.0  ;;  %v1631_v13 = vmax.f32 %v2275_v5, 0.0 }
 0x200   :  { %v1632_v16 = vpack.c.bf16 %v1628_v8, %v1628_v8  ;;  %v1634_v17 = vpack.c.bf16 %v1630_v9, %v1630_v9 }
 0x201   :  { %v1633_v14 = vpack.c.bf16 %v1629_v12, %v1629_v12  ;;  %v1635_v15 = vpack.c.bf16 %v1631_v13, %v1631_v13 }
 0x203   :  { %1931 = vmatprep.mubr.bf16.mxu0 %v1633_v14  ;;  %1971 = vmatprep.mubr.bf16.mxu1 %v1635_v15 }
 0x204   :  { %1932 = vmatmul.mubr.bf16.vlgmr.msra.gmra.mrb[4].mxu0 %v1632_v16  ;;  %1972 = vmatmul.mubr.bf16.vlgmr.msra.gmra.mrb[4].mxu1 %v1634_v17 }
 0x2d7   :  { %v2244_v18 = vpop.f32.mrb[4].mxu0  ;;  %v2266_v19 = vpop.f32.mrb[4].mxu1 }
 0x2d8   :  { %v2245_v21 = vpop.f32.mrb[5].mxu0  ;;  %v2267_v22 = vpop.f32.mrb[5].mxu1 }
 0x2d9   :  { %v2246_v23 = vadd.f32 %v2245_v21, %v2244_v18  ;;  %v2268_v24 = vadd.f32 %v2267_v22, %v2266_v19  ;;  %v2247_v25 = vpop.f32.mrb[6].mxu0  ;;  %v2269_v26 = vpop.f32.mrb[6].mxu1 }
 0x2da   :  { %v2248_v27 = vpop.f32.mrb[7].mxu0  ;;  %v2270_v28 = vpop.f32.mrb[7].mxu1 }
 0x2db   :  { %v1934_v29 = vadd.f32 %v2246_v23, %v2195_v20 }
 0x2dd   :  { %v1974_v30 = vadd.f32 %v2268_v24, %v1934_v29 }
 0x2df   :  { %1979 = vst [vmem:[#allocation11] sm:$0xff] %v1974_v30 }
 0x2e0   :  { %2758 = shalt.err (!%p2755_p2)
}
 0x2e1   :  { %s2759_s6 = scalar_lea.hbm %s2895_s5, 128 }
 0x2e2   :  { %p2760_p3 = scmp.ne.s32.totalorder %s2895_s5, %s2759_s6  ;;  %p2763_p4 = scmp.lt.u32.totalorder %s2759_s6, %s2895_s5 }
 0x2e4   :  { %p2765_p5 = pnand %p2763_p4, %p2760_p3 }
 0x2e6   :  { %2768 = shalt.err (!%p2765_p5)
}
 0x2e7   :  { %1989 = dma.vmem_to_hbm [thread:$0]  %s1987_s28, 128, %s2895_s5, [#allocation4]  }
 0x2e8   :  { %2775 = dma.done.wait [#allocation4], 128  }
 0x2e9   :  { %2776 = vsyncadd [#allocation4], 4294967168 }
 0x2ea   :  { %1993 = vsyncpa [#allocation3], 1 }
 0x2eb   :  { %1994 = vsyncpa [#allocation6], 1 }
 0x2ec   :  { %1995 = vsyncpa [#allocation9], 1 }
 0x2ed   :  { %1996 = vsyncpa [#allocation4], 1 }

</bundles_post_ra>
